<compile_context>
chip_gen: v7x
topology: tpu7x:2x2x1
jax: 0.10.0
libtpu: 0.0.40
codegen_flags: <defaults>
</compile_context>

<pallas_src>
import functools

import jax
import jax.numpy as jnp
from jax.experimental import pallas as pl
from jax.experimental.pallas import tpu as pltpu


# ------------------------- config (mirrors default_config) ------------------
NUM_OUTPUTS = 1
SB_WEIGHTS = 1.0
BALANCE_WEIGHTS = (1.0,)

_LANES = 128
_MAX_TILE_PIXELS = 32768                  # big lane-dense tiles (review item)
_VMEM_BUDGET_BYTES = 10 * 1024 * 1024     # stays under v5e's 16 MiB default limit


def _round_up(x, m):
    return (x + m - 1) // m * m


def _ce_kernel(num_classes,
               logits_ref, target_ref,       # inputs  (C, T) / (1, T)
               sum_ref, cnt_ref,             # outputs (1, 1) / (1, 1) per (image, split)
               cls_ref, acc_sum, acc_cnt):   # scratch (C, T) i32, (1, T) f32, (1, T) f32
    j = pl.program_id(2)

    @pl.when(j == 0)
    def _():
        acc_sum[...] = jnp.zeros_like(acc_sum)
        acc_cnt[...] = jnp.zeros_like(acc_cnt)
        # class-index iota materialized once per pixel-column sweep
        cls_ref[...] = jax.lax.broadcasted_iota(jnp.int32, cls_ref.shape, 0)

    x = logits_ref[...].astype(jnp.float32)      # (C, T): classes on sublanes
    t = target_ref[...].astype(jnp.int32)        # (1, T): int8 on the wire, widened here

    # numerically stable log-sum-exp over the class (sublane) axis
    m = jnp.max(x, axis=0, keepdims=True)                                # (1, T)
    lse = jnp.log(jnp.sum(jnp.exp(x - m), axis=0, keepdims=True)) + m    # (1, T)

    # gather logit at the target class via one-hot select (no dynamic gather)
    tgt_logit = jnp.sum(jnp.where(cls_ref[...] == t, x, 0.0),
                        axis=0, keepdims=True)                           # (1, T)

    # padded tail pixels carry target == num_classes (ignore_index) -> no tail mask
    valid = t != num_classes                                             # (1, T)

    # cheap per-step accumulation (VPU only); XLU reduce deferred to epilogue
    acc_sum[...] += jnp.where(valid, lse - tgt_logit, 0.0)
    acc_cnt[...] += valid.astype(jnp.float32)

    @pl.when(j == pl.num_programs(2) - 1)
    def _():
        sum_ref[...] = jnp.zeros_like(sum_ref) + jnp.sum(acc_sum[...])
        cnt_ref[...] = jnp.zeros_like(cnt_ref) + jnp.sum(acc_cnt[...])


def _cross_entropy_single(logits_nchw, target_nhw, num_classes,
                          max_tile_pixels=_MAX_TILE_PIXELS):
    """nn.CrossEntropyLoss(ignore_index=num_classes) on NCHW logits."""
    n, c, h, w = logits_nchw.shape
    hw = h * w

    # int8 labels cut HBM traffic; ignore_index == num_classes must fit in int8
    tgt_dtype = jnp.int8 if num_classes <= 126 else jnp.int32

    # ---- tile-size selection: large lane-dense tiles, bounded by a VMEM budget ----
    c_pad = _round_up(c, 8)
    lg_bytes = jnp.dtype(logits_nchw.dtype).itemsize
    tg_bytes = jnp.dtype(tgt_dtype).itemsize
    # per-pixel VMEM: double-buffered logits + class-iota scratch + 2 f32 accs
    # + double-buffered targets
    bytes_per_px = 2 * c_pad * lg_bytes + 4 * c_pad + 8 + 2 * tg_bytes
    vmem_cap = max(_LANES, (_VMEM_BUDGET_BYTES // bytes_per_px) // _LANES * _LANES)
    max_tile = min(max_tile_pixels, vmem_cap)

    hw128 = _round_up(hw, _LANES)
    est_tiles = pl.cdiv(hw128, max_tile)
    # second parallel axis over pixels keeps both v7x TensorCores busy for small N
    n_splits = 2 if est_tiles >= 2 else 1
    total_tiles = _round_up(est_tiles, n_splits)
    tile_hw = _round_up(pl.cdiv(hw128, total_tiles), _LANES)
    hw_pad = tile_hw * total_tiles
    tiles_per_split = total_tiles // n_splits

    # native NCHW: free reshape, no transpose / no extra HBM round-trip; logits
    # keep their input dtype (bf16 stays bf16 on the wire; widened in-kernel)
    logits = logits_nchw.reshape(n, c, hw)
    target = target_nhw.reshape(n, 1, hw).astype(tgt_dtype)

    if hw_pad != hw:
        # pad with ignore_index targets so no in-kernel tail mask is needed
        logits = jnp.pad(logits, ((0, 0), (0, 0), (0, hw_pad - hw)))
        target = jnp.pad(target, ((0, 0), (0, 0), (0, hw_pad - hw)),
                         constant_values=num_classes)

    kernel = functools.partial(_ce_kernel, num_classes)

    sums, cnts = pl.pallas_call(
        kernel,
        out_shape=(
            jax.ShapeDtypeStruct((n, n_splits, 1, 1), jnp.float32),
            jax.ShapeDtypeStruct((n, n_splits, 1, 1), jnp.float32),
        ),
        grid_spec=pltpu.PrefetchScalarGridSpec(
            num_scalar_prefetch=0,
            grid=(n, n_splits, tiles_per_split),
            in_specs=[
                pl.BlockSpec((None, c, tile_hw),
                             lambda b, s, j: (b, 0, s * tiles_per_split + j)),
                pl.BlockSpec((None, 1, tile_hw),
                             lambda b, s, j: (b, 0, s * tiles_per_split + j)),
            ],
            out_specs=[
                pl.BlockSpec((None, None, 1, 1), lambda b, s, j: (b, s, 0, 0)),
                pl.BlockSpec((None, None, 1, 1), lambda b, s, j: (b, s, 0, 0)),
            ],
            scratch_shapes=[
                pltpu.VMEM((c, tile_hw), jnp.int32),    # one-hot class iota
                pltpu.VMEM((1, tile_hw), jnp.float32),  # per-lane loss accumulator
                pltpu.VMEM((1, tile_hw), jnp.float32),  # per-lane valid count
            ],
        ),
        compiler_params=pltpu.CompilerParams(
            dimension_semantics=("parallel", "parallel", "arbitrary")),
    )(logits, target)

    total = jnp.sum(sums)
    count = jnp.sum(cnts)
    # NOTE: 0/0 -> NaN when every pixel is ignore_index, matching PyTorch mean.
    return total / count


def cross_entropy_forward(inputs, target, num_classes):
    """Mirrors CrossEntropy.forward with the synthetic config above."""
    if NUM_OUTPUTS == 1 and not isinstance(inputs, (list, tuple)):
        inputs = [inputs]
    if len(BALANCE_WEIGHTS) == len(inputs):
        return sum(w * _cross_entropy_single(x, target, num_classes)
                   for w, x in zip(BALANCE_WEIGHTS, inputs))
    elif len(inputs) == 1:
        return SB_WEIGHTS * _cross_entropy_single(inputs[0], target, num_classes)
    else:
        raise ValueError('lengths of prediction and target are not identical!')


def _reference_loss(logits_nchw, target_nhw, num_classes):
    """Pure-JAX reference (matches nn.CrossEntropyLoss ignore_index mean)."""
    n, c, h, w = logits_nchw.shape
    lg = jnp.transpose(logits_nchw, (0, 2, 3, 1)).reshape(-1, c).astype(jnp.float32)
    tg = target_nhw.reshape(-1)
    valid = tg != num_classes
    lse = jax.nn.logsumexp(lg, axis=-1)
    picked = jnp.take_along_axis(lg, jnp.clip(tg, 0, c - 1)[:, None], axis=-1)[:, 0]
    return jnp.sum(jnp.where(valid, lse - picked, 0.0)) / jnp.sum(valid)


if __name__ == "__main__":
    key = jax.random.PRNGKey(0)
    k1, k2, k3, k4 = jax.random.split(key, 4)

    # Case 1: small base case (N, C, H, W) = (2, 4, 16, 16); C = num_classes
    N, C, H, W = 2, 4, 16, 16
    num_classes = C
    logits = jax.random.normal(k1, (N, C, H, W), dtype=jnp.float32)
    # labels in [0, num_classes]; num_classes acts as ignore_index
    target = jax.random.randint(k2, (N, H, W), 0, num_classes + 1, dtype=jnp.int32)
    loss = jax.block_until_ready(cross_entropy_forward(logits, target, num_classes))
    ref = SB_WEIGHTS * _reference_loss(logits, target, num_classes)
    assert jnp.allclose(loss, ref, rtol=1e-5, atol=1e-5), (loss, ref)

    # Case 2: HW not a multiple of 128 + large enough to take the 2-way pixel
    # split path (exercises padding with ignore_index and the split grid axis)
    N2, C2, H2, W2 = 1, 4, 250, 250
    logits2 = jax.random.normal(k3, (N2, C2, H2, W2), dtype=jnp.float32)
    target2 = jax.random.randint(k4, (N2, H2, W2), 0, C2 + 1, dtype=jnp.int32)
    loss2 = jax.block_until_ready(cross_entropy_forward(logits2, target2, C2))
    ref2 = SB_WEIGHTS * _reference_loss(logits2, target2, C2)
    assert jnp.allclose(loss2, ref2, rtol=1e-4, atol=1e-4), (loss2, ref2)

    print("KERNEL_OK")
</pallas_src>

<mosaic_0001>
module attributes {stable_mosaic.version = 11 : i64} {
  func.func @_ce_kernel(%arg0: i32, %arg1: i32, %arg2: i32, %arg3: memref<1x4x256xf32, #tpu.memory_space<vmem>>, %arg4: memref<1x1x256xi8, #tpu.memory_space<vmem>>, %arg5: memref<1x1x1x1xf32, #tpu.memory_space<vmem>>, %arg6: memref<1x1x1x1xf32, #tpu.memory_space<vmem>>, %arg7: memref<4x256xi32, #tpu.memory_space<vmem>>, %arg8: memref<1x256xf32, #tpu.memory_space<vmem>>, %arg9: memref<1x256xf32, #tpu.memory_space<vmem>>) attributes {dimension_semantics = [#tpu.dimension_semantics<parallel>, #tpu.dimension_semantics<parallel>, #tpu.dimension_semantics<arbitrary>], iteration_bounds = array<i64: 2, 1, 1>, scalar_prefetch = 0 : i64, scratch_operands = 3 : i64, tpu.core_type = #tpu.core_type<tc>, window_params = [{transform_indices = @transform_0, window_bounds = array<i64: 1, 4, 256>}, {transform_indices = @transform_1, window_bounds = array<i64: 1, 1, 256>}, {transform_indices = @transform_2, window_bounds = array<i64: 1, 1, 1, 1>}, {transform_indices = @transform_3, window_bounds = array<i64: 1, 1, 1, 1>}]} {
    %c0_i32 = arith.constant 0 : i32
    %0 = arith.cmpi eq, %arg2, %c0_i32 : i32
    %1 = arith.extui %0 : i1 to i32
    %c0_i32_0 = arith.constant 0 : i32
    %2 = arith.cmpi ne, %1, %c0_i32_0 : i32
    scf.if %2 {
      %cst_22 = arith.constant 0.000000e+00 : f32
      %40 = vector.broadcast %cst_22 : f32 to vector<1x256xf32>
      %c0_23 = arith.constant 0 : index
      %c0_24 = arith.constant 0 : index
      %41 = vector.load %arg8[%c0_23, %c0_24] : memref<1x256xf32, #tpu.memory_space<vmem>>, vector<1x256xf32>
      tpu.vector_store %arg8[%c0_23, %c0_24], %40 {strides = array<i32>} : memref<1x256xf32, #tpu.memory_space<vmem>>, vector<1x256xf32>,
      %cst_25 = arith.constant 0.000000e+00 : f32
      %42 = vector.broadcast %cst_25 : f32 to vector<1x256xf32>
      %c0_26 = arith.constant 0 : index
      %c0_27 = arith.constant 0 : index
      %43 = vector.load %arg9[%c0_26, %c0_27] : memref<1x256xf32, #tpu.memory_space<vmem>>, vector<1x256xf32>
      tpu.vector_store %arg9[%c0_26, %c0_27], %42 {strides = array<i32>} : memref<1x256xf32, #tpu.memory_space<vmem>>, vector<1x256xf32>,
      %44 = tpu.iota {dimensions = array<i32: 0>} : vector<4x256xi32>
      %c0_28 = arith.constant 0 : index
      %c0_29 = arith.constant 0 : index
      %45 = vector.load %arg7[%c0_28, %c0_29] : memref<4x256xi32, #tpu.memory_space<vmem>>, vector<4x256xi32>
      tpu.vector_store %arg7[%c0_28, %c0_29], %44 {strides = array<i32>} : memref<4x256xi32, #tpu.memory_space<vmem>>, vector<4x256xi32>,
    } else {
    }
    %c0 = arith.constant 0 : index
    %c0_1 = arith.constant 0 : index
    %c0_2 = arith.constant 0 : index
    %3 = vector.load %arg3[%c0, %c0_1, %c0_2] : memref<1x4x256xf32, #tpu.memory_space<vmem>>, vector<1x4x256xf32>
    %4 = vector.shape_cast %3 : vector<1x4x256xf32> to vector<4x256xf32>
    %c0_3 = arith.constant 0 : index
    %c0_4 = arith.constant 0 : index
    %c0_5 = arith.constant 0 : index
    %5 = vector.load %arg4[%c0_3, %c0_4, %c0_5] : memref<1x1x256xi8, #tpu.memory_space<vmem>>, vector<1x1x256xi8>
    %6 = vector.shape_cast %5 : vector<1x1x256xi8> to vector<1x256xi8>
    %7 = arith.extsi %6 : vector<1x256xi8> to vector<1x256xi32>
    %cst = arith.constant dense<0xFF800000> : vector<256xf32>
    %8 = vector.multi_reduction <maximumf>, %4, %cst [0] : vector<4x256xf32> to vector<256xf32>
    %9 = vector.shape_cast %8 : vector<256xf32> to vector<1x256xf32>
    %10 = vector.broadcast %9 : vector<1x256xf32> to vector<4x256xf32>
    %11 = arith.subf %4, %10 : vector<4x256xf32>
    %12 = math.exp %11 : vector<4x256xf32>
    %cst_6 = arith.constant dense<0.000000e+00> : vector<256xf32>
    %13 = vector.multi_reduction <add>, %12, %cst_6 [0] : vector<4x256xf32> to vector<256xf32>
    %14 = vector.shape_cast %13 : vector<256xf32> to vector<1x256xf32>
    %15 = math.log %14 : vector<1x256xf32>
    %16 = arith.addf %15, %9 : vector<1x256xf32>
    %c0_7 = arith.constant 0 : index
    %c0_8 = arith.constant 0 : index
    %17 = vector.load %arg7[%c0_7, %c0_8] : memref<4x256xi32, #tpu.memory_space<vmem>>, vector<4x256xi32>
    %18 = vector.broadcast %7 : vector<1x256xi32> to vector<4x256xi32>
    %19 = arith.cmpi eq, %17, %18 : vector<4x256xi32>
    %cst_9 = arith.constant 0.000000e+00 : f32
    %20 = vector.broadcast %cst_9 : f32 to vector<4x256xf32>
    %21 = arith.select %19, %4, %20 : vector<4x256xi1>, vector<4x256xf32>
    %cst_10 = arith.constant dense<0.000000e+00> : vector<256xf32>
    %22 = vector.multi_reduction <add>, %21, %cst_10 [0] : vector<4x256xf32> to vector<256xf32>
    %23 = vector.shape_cast %22 : vector<256xf32> to vector<1x256xf32>
    %c4_i32 = arith.constant 4 : i32
    %24 = vector.broadcast %c4_i32 : i32 to vector<1x256xi32>
    %25 = arith.cmpi ne, %7, %24 : vector<1x256xi32>
    %c0_11 = arith.constant 0 : index
    %c0_12 = arith.constant 0 : index
    %26 = vector.load %arg8[%c0_11, %c0_12] : memref<1x256xf32, #tpu.memory_space<vmem>>, vector<1x256xf32>
    %27 = arith.subf %16, %23 : vector<1x256xf32>
    %cst_13 = arith.constant 0.000000e+00 : f32
    %28 = vector.broadcast %cst_13 : f32 to vector<1x256xf32>
    %29 = arith.select %25, %27, %28 : vector<1x256xi1>, vector<1x256xf32>
    %30 = arith.addf %26, %29 : vector<1x256xf32>
    %c0_14 = arith.constant 0 : index
    %c0_15 = arith.constant 0 : index
    %31 = vector.load %arg8[%c0_14, %c0_15] : memref<1x256xf32, #tpu.memory_space<vmem>>, vector<1x256xf32>
    tpu.vector_store %arg8[%c0_14, %c0_15], %30 {strides = array<i32>} : memref<1x256xf32, #tpu.memory_space<vmem>>, vector<1x256xf32>,
    %c0_16 = arith.constant 0 : index
    %c0_17 = arith.constant 0 : index
    %32 = vector.load %arg9[%c0_16, %c0_17] : memref<1x256xf32, #tpu.memory_space<vmem>>, vector<1x256xf32>
    %33 = arith.extui %25 : vector<1x256xi1> to vector<1x256xi32>
    %34 = arith.sitofp %33 : vector<1x256xi32> to vector<1x256xf32>
    %35 = arith.addf %32, %34 : vector<1x256xf32>
    %c0_18 = arith.constant 0 : index
    %c0_19 = arith.constant 0 : index
    %36 = vector.load %arg9[%c0_18, %c0_19] : memref<1x256xf32, #tpu.memory_space<vmem>>, vector<1x256xf32>
    tpu.vector_store %arg9[%c0_18, %c0_19], %35 {strides = array<i32>} : memref<1x256xf32, #tpu.memory_space<vmem>>, vector<1x256xf32>,
    %c0_i32_20 = arith.constant 0 : i32
    %37 = arith.cmpi eq, %arg2, %c0_i32_20 : i32
    %38 = arith.extui %37 : i1 to i32
    %c0_i32_21 = arith.constant 0 : i32
    %39 = arith.cmpi ne, %38, %c0_i32_21 : i32
    scf.if %39 {
      %cst_22 = arith.constant 0.000000e+00 : f32
      %40 = vector.broadcast %cst_22 : f32 to vector<1x1xf32>
      %c0_23 = arith.constant 0 : index
      %c0_24 = arith.constant 0 : index
      %41 = vector.load %arg8[%c0_23, %c0_24] : memref<1x256xf32, #tpu.memory_space<vmem>>, vector<1x256xf32>
      %42 = vector.shape_cast %41 : vector<1x256xf32> to vector<1x1x256xf32>
      %cst_25 = arith.constant dense<0.000000e+00> : vector<1xf32>
      %43 = vector.multi_reduction <add>, %42, %cst_25 [1, 2] : vector<1x1x256xf32> to vector<1xf32>
      %44 = vector.shape_cast %43 : vector<1xf32> to vector<1x1x1xf32>
      %45 = vector.extract %44[0, 0, 0] : f32 from vector<1x1x1xf32>
      %46 = vector.broadcast %45 : f32 to vector<1x1xf32>
      %47 = arith.addf %40, %46 : vector<1x1xf32>
      %c0_26 = arith.constant 0 : index
      %c0_27 = arith.constant 0 : index
      %c0_28 = arith.constant 0 : index
      %c0_29 = arith.constant 0 : index
      %48 = vector.load %arg5[%c0_26, %c0_27, %c0_28, %c0_29] : memref<1x1x1x1xf32, #tpu.memory_space<vmem>>, vector<1x1x1x1xf32>
      %49 = vector.shape_cast %48 : vector<1x1x1x1xf32> to vector<1x1xf32>
      %50 = vector.shape_cast %47 : vector<1x1xf32> to vector<1x1x1x1xf32>
      tpu.vector_store %arg5[%c0_26, %c0_27, %c0_28, %c0_29], %50 {strides = array<i32>} : memref<1x1x1x1xf32, #tpu.memory_space<vmem>>, vector<1x1x1x1xf32>,
      %cst_30 = arith.constant 0.000000e+00 : f32
      %51 = vector.broadcast %cst_30 : f32 to vector<1x1xf32>
      %c0_31 = arith.constant 0 : index
      %c0_32 = arith.constant 0 : index
      %52 = vector.load %arg9[%c0_31, %c0_32] : memref<1x256xf32, #tpu.memory_space<vmem>>, vector<1x256xf32>
      %53 = vector.shape_cast %52 : vector<1x256xf32> to vector<1x1x256xf32>
      %cst_33 = arith.constant dense<0.000000e+00> : vector<1xf32>
      %54 = vector.multi_reduction <add>, %53, %cst_33 [1, 2] : vector<1x1x256xf32> to vector<1xf32>
      %55 = vector.shape_cast %54 : vector<1xf32> to vector<1x1x1xf32>
      %56 = vector.extract %55[0, 0, 0] : f32 from vector<1x1x1xf32>
      %57 = vector.broadcast %56 : f32 to vector<1x1xf32>
      %58 = arith.addf %51, %57 : vector<1x1xf32>
      %c0_34 = arith.constant 0 : index
      %c0_35 = arith.constant 0 : index
      %c0_36 = arith.constant 0 : index
      %c0_37 = arith.constant 0 : index
      %59 = vector.load %arg6[%c0_34, %c0_35, %c0_36, %c0_37] : memref<1x1x1x1xf32, #tpu.memory_space<vmem>>, vector<1x1x1x1xf32>
      %60 = vector.shape_cast %59 : vector<1x1x1x1xf32> to vector<1x1xf32>
      %61 = vector.shape_cast %58 : vector<1x1xf32> to vector<1x1x1x1xf32>
      tpu.vector_store %arg6[%c0_34, %c0_35, %c0_36, %c0_37], %61 {strides = array<i32>} : memref<1x1x1x1xf32, #tpu.memory_space<vmem>>, vector<1x1x1x1xf32>,
    } else {
    }
    return
  }
  func.func @transform_0(%arg0: i32, %arg1: i32, %arg2: i32) -> (i32, i32, i32) {
    %c1_i32 = arith.constant 1 : i32
    %0 = arith.muli %arg1, %c1_i32 : i32
    %1 = arith.addi %0, %arg2 : i32
    %c0_i32 = arith.constant 0 : i32
    %c0_i32_0 = arith.constant 0 : i32
    return %arg0, %c0_i32, %1 : i32, i32, i32
  }
  func.func @transform_1(%arg0: i32, %arg1: i32, %arg2: i32) -> (i32, i32, i32) {
    %c1_i32 = arith.constant 1 : i32
    %0 = arith.muli %arg1, %c1_i32 : i32
    %1 = arith.addi %0, %arg2 : i32
    %c0_i32 = arith.constant 0 : i32
    %c0_i32_0 = arith.constant 0 : i32
    return %arg0, %c0_i32, %1 : i32, i32, i32
  }
  func.func @transform_2(%arg0: i32, %arg1: i32, %arg2: i32) -> (i32, i32, i32, i32) {
    %c0_i32 = arith.constant 0 : i32
    %c0_i32_0 = arith.constant 0 : i32
    %c0_i32_1 = arith.constant 0 : i32
    return %arg0, %arg1, %c0_i32, %c0_i32_0 : i32, i32, i32, i32
  }
  func.func @transform_3(%arg0: i32, %arg1: i32, %arg2: i32) -> (i32, i32, i32, i32) {
    %c0_i32 = arith.constant 0 : i32
    %c0_i32_0 = arith.constant 0 : i32
    %c0_i32_1 = arith.constant 0 : i32
    return %arg0, %arg1, %c0_i32, %c0_i32_0 : i32, i32, i32, i32
  }
}

</mosaic_0001>

<bundles_post_ra>
// kernel: tpu_custom_call.1
= control target key start
LH: loop header
LB: loop body
LE: loop exit
PB: predicated region body
PF: predicated region fallthrough
CT: control target
= control target key end

     0   :  { %9 = vsyncpa [#allocation6], 0  ;;  %s1004_s0 = inlined_call_operand.hbm [shape: f32[2,4,256], index: 0, kind: input, shape index: {}]   ;;  %s1005_s1 = inlined_call_operand.vmem [shape: s8[2,1,256], index: 1, kind: input, shape index: {}]   ;;  %s1006_s2 = inlined_call_operand.vmem [shape: f32[2,1,1,1], index: 2, kind: output, shape index: {0}]   ;;  %s1007_s3 = inlined_call_operand.vmem [shape: f32[2,1,1,1], index: 3, kind: output, shape index: {1}]  }
   0x1   :  { %11 = vsyncpa [#allocation6 + $0x1], 0  ;;  %s820_s12 = smov 0   ;;  %s822_s13 = smov 0  }
   0x2   :  { %s824_s14 = smov 0   ;;  %s826_s15 = smov 0  }
   0x3   :  { %s828_s16 = smov 0   ;;  %s830_s17 = smov 0  }
   0x4 LB: > { %s631_s18 = sadd.s32 4294967295, %s794_s17   ;;  %s36_s19 = sadd.s32 1, %s790_s16  ;;  %s794_s17 = sphi %s830_s17, %s17_s17   ;;  %s790_s16 = sphi %s828_s16, %s1019_s16   ;;  %s786_s15 = sphi %s826_s15, %s1018_s15   ;;  %s782_s14 = sphi %s824_s14, %s1017_s14   ;;  %s778_s13 = sphi %s822_s13, %s1016_s13   ;;  %s774_s12 = sphi %s820_s12, %s1015_s12  }
   0x5   : > { %p38_p0 = scmp.ge.s32.totalorder %s36_s19, 2  ;;  %s47_s20 = sadd.s32 1, %s782_s14 }
   0x6   : > { %p54_p1 = scmp.ne.s32.totalorder %s782_s14, %s778_s13  ;;  %p55_p2 = scmp.eq.s32.totalorder %s794_s17, 0 }
   0x7   : > { %s1021_s19 = smov (%p38_p0, %s36_s19), 0  ;;  %p60_p4 = scmp.ne.s32.totalorder %s778_s13, %s774_s12 }
   0x8   : > { %p856_p3 = por %p55_p2, %p54_p1  ;;  %s42_s22 = ssub.s32 %s790_s16, %s1021_s19 }
   0x9   : > { %p61_p5 = scmp.eq.s32.totalorder %s631_s18, 0  ;;  %p45_p6 = scmp.eq.s32.totalorder %s42_s22, 0 }
   0xa   : > { %p655_p8 = scmp.lt.s32.totalorder %s794_s17, 2  ;;  %s170_s25 = sand.u32 1, %s782_s14  }
   0xb   : > { %p863_p7 = por %p61_p5, %p60_p4  ;;  %s644_s26 = sshll.u32 %s790_s16, 7 }
   0xc   : > { %s869_s24 = scalar_select %p45_p6, %s782_s14, %s47_s20  }
   0xd   : > { %s635_s27 = sshll.u32 %s170_s25, 3  ;;  %s876_s30 = scalar_lea.hbm %s1004_s0, %s644_s26 }
   0xe   : > { %s174_s4 = scalar_lea.vmem [#allocation5], %s635_s27  ;;  %p880_p9 = pnand %p655_p8, %p856_p3 }
   0xf   : > { %s185_s5 = sshll.u32 %s174_s4, 4  ;;  %s171_s7 = scalar_lea.sflag [#allocation6], %s170_s25  ;;  %s884_s5 = int_to_ptr.vmem [resolvable:$true] %s185_s5 }
  0x10   : > { %s714_s8 = scalar_lea.hbm %s876_s30, 128  ;;  %p716_p13 = pneg %p880_p9 }
  0x11   : > { %p715_p12 = scmp.ne.s32.totalorder %s876_s30, %s714_s8  ;;  %s719_s11 = scalar_lea.hbm %s1004_s0, 256 }
  0x12   : > { %p720_p2 = scmp.lt.u32.totalorder %s876_s30, %s1004_s0  ;;  %p721_p3 = scmp.lt.u32.totalorder %s719_s11, %s714_s8 }
  0x13   : > { %p717_p0 = pnand %p716_p13, %p715_p12  ;;  %p723_p5 = scmp.lt.u32.totalorder %s714_s8, %s876_s30 }
  0x14   : > { %p722_p4 = por %p721_p3, %p720_p2 }
  0x15   : > { %p718_p1 = pneg %p717_p0 }
  0x16   : > { %p724_p6 = por %p723_p5, %p722_p4 }
  0x18   : > { %p725_p8 = pnand %p724_p6, %p718_p1 }
  0x1a   : > { %728 = shalt.err (!%p725_p8)
}
  0x1b   : > { %s729_s20 = scalar_lea.vmem %s884_s5, 128  ;;  %s796_s21 = smov [#allocation5]  }
  0x1c   : > { %p730_p12 = scmp.ne.s32.totalorder %s884_s5, %s729_s20  ;;  %s734_s22 = sshll.u32 %s796_s21, 4  ;;  %s735_s22 = int_to_ptr.vmem [resolvable:$false] %s734_s22 }
  0x1d   : > { %s736_s25 = scalar_lea.vmem %s735_s22, 256  ;;  %p737_p11 = scmp.lt.s32.totalorder %s884_s5, %s735_s22 }
  0x1e   : > { %p732_p0 = pnand %p730_p12, %p716_p13  ;;  %p738_p2 = scmp.lt.s32.totalorder %s736_s25, %s729_s20 }
  0x20   : > { %p733_p10 = pneg %p732_p0  ;;  %p739_p3 = por %p738_p2, %p737_p11 }
  0x22   : > { %p740_p4 = pnand %p739_p3, %p733_p10 }
  0x24   : > { %743 = shalt.err (!%p740_p4)
}
  0x25   : > { %654 = dma.hbm_to_vmem [thread:$0]  (!%p880_p9), %s876_s30, 128, %s884_s5, %s171_s7  }
  0x26   : > { %p1011_p1 = scmp.lt.s32.totalorder %s794_s17, 3  ;;  %p1012_p5 = scmp.ge.s32.totalorder %s794_s17, 1 }
  0x28   : > { %p205_p13 = pnand %p1012_p5, %p1011_p1 }
  0x29   : > { %s210_s26 = sand.u32 (!%p205_p13), 1, %s778_s13  }
  0x2a   : > { %208 = sbr.rel (%p205_p13) target bundleno = 348 (0x15c), region = 28  ;;  %s639_s27 = sshll.u32 (!%p205_p13), %s210_s26, 3 }
  0x2b   : > { %s211_s28 = scalar_lea.sflag (!%p205_p13), [#allocation6], %s210_s26  ;;  %s214_s29 = scalar_lea.vmem (!%p205_p13), [#allocation5], %s639_s27 }
  0x31   : > { %769 = dma.done.wait (%p863_p7), %s211_s28, 128  }
  0x32   : > { %771 = vsyncadd (%p863_p7), %s211_s28, 4294967168  ;;  %p257_p10 = scmp.lt.s32.totalorder %s786_s15, 1  ;;  %v282_v0 = vlaneseq  ;;  %v797_v2 = vmov 1966171168   ;;  %v798_v4 = vmov 0.0   ;;  %vm304_vm1 = vcmask 1043456  }
  0x33   : > { %v397_v3 = vunpack.c.l.s4 %v797_v2  ;;  %v298_v6 = vld [vmem:[%s214_s29] sm:$0xff]  ;;  %v799_v25 = vmov 839922192   ;;  %vm453_vm4 = vcmask 1040384   ;;  %vm468_vm5 = vcmask 0  }
  0x34   : > { %s1023_s15 = smov (!%p257_p10, %s786_s15), 1  ;;  %vm926_vm0 = vcmp.lt.s32.totalorder %v282_v0, 256  ;;  %v938_v8 = vshrl.u32 %v282_v0, 7  ;;  %v302_v10 = vcombine.high %v298_v6, %v298_v6  ;;  %v305_v11 = vsel %vm304_vm1, %v298_v6, -inf }
  0x35   : > { %286 = vst.msk [vmem:[#allocation3] sm:$0x3] %vm926_vm0, %v798_v4  ;;  %287 = vst.msk [vmem:[#allocation4] sm:$0x3] %vm926_vm0, %v798_v4  ;;  %s640_s23 = sshll.u32 %s1023_s15, 1  ;;  %v398_v5 = vunpack.c.0.s8 %v397_v3  ;;  %v306_v12 = vrot.slane %v305_v11, 4  ;;  %v291_v26 = vunpack.c.l.s4 %v799_v25  ;;  %s271_s8 = scalar_lea.vmem %s1006_s2, %s1023_s15 }
  0x36   : > { %s263_s5 = scalar_lea.vmem %s1005_s1, %s640_s23  ;;  %v312_v13 = vsel %vm304_vm1, %v302_v10, -inf  ;;  %v953_v30 = vsub.s32 0, %v938_v8  ;;  %v356_v31 = vsub.s32 4, %v938_v8  ;;  %s277_s12 = scalar_lea.vmem %s1007_s3, %s1023_s15 }
  0x37   : > { %v299_v7 = vld [vmem:[%s263_s5] sm:$0x3]  ;;  %v946_v14 = vsub.s32 %v398_v5, %v938_v8  ;;  %v307_v15 = vmax.f32 %v305_v11, %v306_v12  ;;  %v313_v16 = vrot.slane %v312_v13, 4  ;;  %v292_v34 = vunpack.c.0.s8 %v291_v26 }
  0x38   : > { %v940_v9 = vunpack.c.0.s8 %v299_v7 }
  0x39   : > { %v308_v19 = vrot.slane %v307_v15, 2  ;;  %v314_v20 = vmax.f32 %v312_v13, %v313_v16  ;;  %v295_v39 = vsub.s32 %v292_v34, %v938_v8 }
  0x3a   : > { %vm386_vm2 = vcmp.ne.s32.totalorder %v940_v9, 4  ;;  %v353_v36 = vrot.slane %v940_v9, %v953_v30  ;;  %v357_v37 = vrot.slane %v940_v9, %v356_v31 }
  0x3b   : > { %v641_v17 = vsel %vm386_vm2, 1.0, %v798_v4  ;;  %v309_v23 = vmax.f32 %v307_v15, %v308_v19  ;;  %v315_v24 = vrot.slane %v314_v20, 2  ;;  %v296_v44 = vrot.slane %v938_v8, %v295_v39 }
  0x3c   : > { %v427_v18 = vrot.slane %v641_v17, %v946_v14  ;;  %v417_v21 = vld [vmem:[#allocation4] sm:$0x3]  ;;  %v361_v41 = vrot.slane %v353_v36, %v953_v30  ;;  %v365_v42 = vrot.slane %v357_v37, %v953_v30 }
  0x3d   : > { %v310_v28 = vrot.slane %v309_v23, 1  ;;  %v316_v29 = vmax.f32 %v314_v20, %v315_v24 }
  0x3e   : > { %v434_v22 = vrot.slane %v427_v18, %v946_v14  ;;  %v366_v45 = vcombine.low %v361_v41, %v365_v42 }
  0x3f   : > { %v311_v32 = vmax.f32 %v309_v23, %v310_v28  ;;  %v317_v33 = vrot.slane %v316_v29, 1 }
  0x40   : > { %v436_v27 = vadd.f32 %v434_v22, %v417_v21  ;;  %vm367_vm3 = vcmp.eq.s32.totalorder %v296_v44, %v366_v45 }
  0x41   : > { %v318_v35 = vmax.f32 %v316_v29, %v317_v33  ;;  %v368_v46 = vsel %vm367_vm3, %v298_v6, 0.0  ;;  %v387_v29 = vld [vmem:[#allocation3] sm:$0x3] }
  0x42   : > { %437 = vst.msk [vmem:[#allocation4] sm:$0x3] %vm926_vm0, %v436_v27  ;;  %v370_v48 = vcombine.high %v368_v46, %v368_v46  ;;  %v372_v52 = vsel %vm304_vm1, %v368_v46, 0.0 }
  0x43   : > { %v321_v38 = vcombine.low %v311_v32, %v318_v35  ;;  %v373_v57 = vrot.slane %v372_v52, 4 }
  0x44   : > { %v379_v56 = vsel %vm304_vm1, %v370_v48, 0.0 }
  0x45   : > { %v323_v40 = vsub.f32 %v298_v6, %v321_v38  ;;  %v380_v60 = vrot.slane %v379_v56, 4  ;;  %v374_v63 = vadd.f32 %v373_v57, %v372_v52 }
  0x47   : > { %v324_v43 = vmul.f32 1.442695, %v323_v40  ;;  %v381_v3 = vadd.f32 %v380_v60, %v379_v56  ;;  %v375_v6 = vrot.slane %v374_v63, 2 }
  0x49   : > { %708 = vpow2.f32 %v324_v43  ;;  %v382_v10 = vrot.slane %v381_v3, 2  ;;  %v376_v11 = vadd.f32 %v375_v6, %v374_v63  ;;  %v470_v34 = vld [vmem:[#allocation4] sm:$0x3] }
  0x4b   : > { %v383_v12 = vadd.f32 %v382_v10, %v381_v3  ;;  %v377_v13 = vrot.slane %v376_v11, 1 }
  0x4d   : > { %v384_v15 = vrot.slane %v383_v12, 1  ;;  %v378_v18 = vadd.f32 %v377_v13, %v376_v11 }
  0x4f   : > { %v385_v22 = vadd.f32 %v384_v15, %v383_v12 }
  0x53   : > { %v709_v47 = vpop.eup %708 }
  0x54   : > { %v327_v49 = vcombine.high %v709_v47, %v709_v47  ;;  %v329_v50 = vsel %vm304_vm1, %v709_v47, 0.0 }
  0x55   : > { %v330_v51 = vrot.slane %v329_v50, 4 }
  0x56   : > { %v336_v53 = vsel %vm304_vm1, %v327_v49, 0.0 }
  0x57   : > { %v331_v54 = vadd.f32 %v330_v51, %v329_v50  ;;  %v337_v55 = vrot.slane %v336_v53, 4 }
  0x59   : > { %v332_v58 = vrot.slane %v331_v54, 2  ;;  %v338_v59 = vadd.f32 %v337_v55, %v336_v53 }
  0x5b   : > { %v333_v61 = vadd.f32 %v332_v58, %v331_v54  ;;  %v339_v62 = vrot.slane %v338_v59, 2 }
  0x5d   : > { %v334_v0 = vrot.slane %v333_v61, 1  ;;  %v340_v2 = vadd.f32 %v339_v62, %v338_v59 }
  0x5f   : > { %v335_v4 = vadd.f32 %v334_v0, %v333_v61  ;;  %v341_v5 = vrot.slane %v340_v2, 1 }
  0x61   : > { %v342_v7 = vadd.f32 %v341_v5, %v340_v2  ;;  %710 = vlog2.f32 %v335_v4 }
  0x63   : > { %712 = vlog2.f32 %v342_v7 }
  0x6b   : > { %v711_v16 = vpop.eup %710 }
  0x6c   : > { %v344_v17 = vmul.f32 0.6931472, %v711_v16 }
  0x6d   : > { %v713_v19 = vpop.eup %712 }
  0x6e   : > { %v346_v20 = vmul.f32 0.6931472, %v713_v19  ;;  %v347_v21 = vadd.f32 %v344_v17, %v311_v32  ;;  %v449_v32 = vsub.s32 1, %v938_v8 }
  0x70   : > { %v348_v23 = vadd.f32 %v346_v20, %v318_v35  ;;  %v388_v24 = vsub.f32 %v347_v21, %v378_v18  ;;  %v475_v35 = vrot.slane %v470_v34, %v953_v30  ;;  %v479_v36 = vrot.slane %v470_v34, %v449_v32 }
  0x72   : > { %v389_v25 = vsub.f32 %v348_v23, %v385_v22  ;;  %v482_v41 = vsel %vm453_vm4, %v475_v35, 0.0  ;;  %v483_v42 = vsel %vm453_vm4, %v479_v36, 0.0 }
  0x73   : > { %v484_v43 = vadd.f32 %v483_v42, %v482_v41 }
  0x74   : > { %v392_v26 = vcombine.low %v388_v24, %v389_v25 }
  0x76   : > { %v394_v27 = vsel %vm386_vm2, %v392_v26, 0.0 }
  0x77   : > { %v402_v28 = vrot.slane %v394_v27, %v946_v14 }
  0x79   : > { %v409_v31 = vrot.slane %v402_v28, %v946_v14 }
  0x7b   : > { %v411_v33 = vadd.f32 %v409_v31, %v387_v29 }
  0x7d   : > { %416 = vst.msk [vmem:[#allocation3] sm:$0x3] %vm926_vm0, %v411_v33 }
  0x84   : > { %v441_v37 = vld [vmem:[#allocation3] sm:$0x3] }
  0x85   : > { %v446_v9 = vrot.slane %v441_v37, %v953_v30  ;;  %v450_v38 = vrot.slane %v441_v37, %v449_v32 }
  0x87   : > { %v454_v39 = vsel %vm453_vm4, %v446_v9, 0.0  ;;  %v455_v40 = vsel %vm453_vm4, %v450_v38, 0.0 }
  0x88   : > { %v456_v14 = vadd.f32 %v455_v40, %v454_v39 }
  0x8a   : > { %457 = vadd.xlane.f32.xlu0 %v456_v14 }
  0x8e   : > { %485 = vadd.xlane.f32.xlu0 %v484_v43 }
 0x117   : > { %v458_v1 = vpop.xlane.xlu0 %457 }
 0x118   : > { %v459_v44 = vrot.slane %v458_v1, 4 }
 0x11a   : > { %v460_v8 = vadd.f32 %v459_v44, %v458_v1 }
 0x11b   : > { %v486_v45 = vpop.xlane.xlu0 %485 }
 0x11c   : > { %v461_v46 = vrot.slane %v460_v8, 2  ;;  %v487_v47 = vrot.slane %v486_v45, 4 }
 0x11e   : > { %v488_v48 = vadd.f32 %v487_v47, %v486_v45  ;;  %v462_v49 = vadd.f32 %v461_v46, %v460_v8 }
 0x120   : > { %v489_v30 = vrot.slane %v488_v48, 2  ;;  %v463_v50 = vrot.slane %v462_v49, 1 }
 0x122   : > { %v490_v51 = vadd.f32 %v489_v30, %v488_v48  ;;  %v464_v52 = vadd.f32 %v463_v50, %v462_v49 }
 0x124   : > { %645 = vpush %v464_v52  ;;  %v491_v53 = vrot.slane %v490_v51, 1 }
 0x126   : > { %v492_v54 = vadd.f32 %v491_v53, %v490_v51 }
 0x128   : > { %647 = vpush %v492_v54 }
 0x155   : > { %s646_s9 = spop %645 }
 0x156   : > { %v466_v55 = vstv %s646_s9 }
 0x157   : > { %469 = vst.msk [vmem:[%s271_s8] sm:$0x1] %vm468_vm5, %v466_v55 }
 0x159   : > { %s648_s18 = spop %647 }
 0x15a   : > { %v494_v56 = vstv %s648_s18 }
 0x15b   : > { %496 = vst.msk [vmem:[%s277_s12] sm:$0x1] %vm468_vm5, %v494_v56 }
 0x15c PF: > { %s17_s17 = sadd.s32 1, %s794_s17   ;;  %s1015_s12 = smov %s778_s13 }
 0x15d   : > { %p14_p7 = scmp.ge.s32.totalorder %s17_s17, 4   ;;  %s1016_s13 = smov %s782_s14 }
 0x15e   : > { %s1017_s14 = smov %s869_s24  ;;  %s1018_s15 = smov %s790_s16 }
 0x15f   : > { %s1019_s16 = smov %s1021_s19  ;;  %16 = sbr.rel (!%p14_p7) target bundleno = 4 (0x4), region = 91 }
 0x166   :  { %538 = vsyncpa [#allocation6], 1 }
 0x167   :  { %540 = vsyncpa [#allocation6 + $0x1], 1 }

</bundles_post_ra>
